<compile_context>
chip_gen: v7x
topology: tpu7x:2x2x1
jax: 0.10.0
libtpu: 0.0.40
codegen_flags: <defaults>
</compile_context>

<pallas_src>
import jax
import jax.numpy as jnp
import numpy as np
from jax import lax
from jax.experimental import pallas as pl
from jax.experimental.pallas import tpu as pltpu


def mlp_kernel(x_ref, w1_ref, b1_ref, w2_ref, b2_ref, w3_ref, b3_ref, o_ref):
    # x_ref : (TILE_B, input_size)  natural layout, f32
    # w1_ref: (64, input_size)  (bf16 when use_bf16),  b1_ref: (64, 1) f32
    # w2_ref: (16, 64) f32,                            b2_ref: (16, 1) f32
    # w3_ref: (16, 1)  f32,                            b3_ref: (1, 1)  f32
    # o_ref : (1, TILE_B) f32
    x = x_ref[...]
    if x.dtype != w1_ref.dtype:
        # In-kernel cast (VPU) -- hidden under the next tile's DMA; keeps the
        # HBM read of x at its natural dtype (no wrapper-side cast pass).
        x = x.astype(w1_ref.dtype)

    # Layer 1: contract on the feature dim -> (64, TILE_B); batch rides lanes.
    h1 = lax.dot_general(w1_ref[...], x,
                         dimension_numbers=(((1,), (1,)), ((), ())),
                         preferred_element_type=jnp.float32)
    h1 = jnp.maximum(h1 + b1_ref[...], 0.0)

    # Layer 2: (16, 64) @ (64, TILE_B) -> (16, TILE_B).  W2 stays f32 so h1 is
    # consumed directly (no full-size bf16 re-materialization of h1).
    h2 = jnp.dot(w2_ref[...], h1, preferred_element_type=jnp.float32)
    h2 = jnp.maximum(h2 + b2_ref[...], 0.0)

    # Layer 3 (16 -> 1): elementwise multiply + sublane reduce (VPU/XLU);
    # a K=16, N=1 MXU matmul would be ~pure padding.
    h3 = jnp.sum(w3_ref[...] * h2, axis=0, keepdims=True) + b3_ref[...]

    # Lane-dense (1, TILE_B) store.
    o_ref[...] = jnp.tanh(h3)


def _round_up(a, m):
    return (a + m - 1) // m * m


def classifier_forward(x, params, *, tile_b=16384, use_bf16=True):
    """x: (batch, input_size) f32.  Returns (batch, 1) f32.

    use_bf16=True runs layer 1 (the only MXU-heavy layer) in bf16 with f32
    accumulation; expect ~1e-2-level differences vs. a pure f32 reference.
    """
    w1, b1, w2, b2, w3, b3 = params
    batch, input_size = x.shape
    h1_dim = w1.shape[0]   # 64
    h2_dim = w2.shape[0]   # 16

    # --- tile selection -----------------------------------------------------
    batch_128 = _round_up(batch, 128)
    tile_b = max(128, min(_round_up(tile_b, 128), batch_128))
    # >= 2 tiles whenever the batch allows it, so the 1-D "parallel" grid can
    # shard across the two TensorCores of a v7x chip.
    if batch_128 >= 256:
        tile_b = min(tile_b, _round_up(-(-batch // 2), 128))

    # Honest per-config VMEM estimate: includes the 128-lane padding of the
    # (tile_b, input_size) x block plus the in-kernel bf16 / transposed copies
    # and the f32 h1/h2 intermediates.  Shrink tile_b until it fits.
    in_lanes = _round_up(input_size, 128)

    def vmem_need(tb):
        xb = 2 * tb * in_lanes * 4                    # double-buffered x tiles (f32, lane-padded)
        xc = tb * in_lanes * (2 if use_bf16 else 0)   # in-kernel bf16 copy of x
        xt = tb * in_lanes * (2 if use_bf16 else 4)   # transposed copy for the trans-B matmul
        ob = 2 * 8 * tb * 4                           # double-buffered (1, tb) out (8-sublane pad)
        hb = tb * (h1_dim + h2_dim) * 4               # h1 / h2 f32 intermediates
        return xb + xc + xt + ob + hb + (2 << 20)     # + resident weights / slack

    try:
        vmem_cap = int(pltpu.get_tpu_info().vmem_capacity_bytes)
    except Exception:
        vmem_cap = 64 << 20                           # conservative (v7x per-TC)
    fit_budget = (vmem_cap * 3) // 4
    while tile_b > 128 and vmem_need(tile_b) > fit_budget:
        tile_b = max(128, _round_up(tile_b // 2, 128))

    batch_p = _round_up(batch, tile_b)
    grid = (batch_p // tile_b,)

    # Pad batch only if needed: contiguous row append, no transpose, no cast
    # pass over x in the wrapper.
    if batch_p != batch:
        x = jnp.pad(x, ((0, batch_p - batch), (0, 0)))
    if use_bf16:
        w1 = w1.astype(jnp.bfloat16)                  # tiny; x is cast in-kernel

    vmem_limit = int(min((vmem_cap * 9) // 10,
                         max((vmem_need(tile_b) * 3) // 2, 48 << 20)))
    compiler_params = pltpu.CompilerParams(
        dimension_semantics=("parallel",),
        vmem_limit_bytes=vmem_limit,
    )

    w_bytes = sum(int(np.prod(a.shape)) * a.dtype.itemsize
                  for a in (w1, b1, w2, b2, w3, b3))
    cost = pl.CostEstimate(
        flops=2 * batch_p * (input_size * h1_dim + h1_dim * h2_dim + h2_dim),
        transcendentals=batch_p,                      # tanh
        bytes_accessed=batch_p * input_size * x.dtype.itemsize + batch_p * 4 + w_bytes,
    )

    resident = lambda i: (0, 0)   # weights/biases: same block every grid step
    out = pl.pallas_call(
        mlp_kernel,
        out_shape=jax.ShapeDtypeStruct((1, batch_p), jnp.float32),
        grid=grid,
        in_specs=[
            pl.BlockSpec((tile_b, input_size), lambda i: (i, 0)),  # x (natural layout, pipelined)
            pl.BlockSpec((h1_dim, input_size), resident),          # w1
            pl.BlockSpec((h1_dim, 1), resident),                   # b1
            pl.BlockSpec((h2_dim, h1_dim), resident),              # w2
            pl.BlockSpec((h2_dim, 1), resident),                   # b2
            pl.BlockSpec((h2_dim, 1), resident),                   # w3 (stored (16, 1))
            pl.BlockSpec((1, 1), resident),                        # b3
        ],
        out_specs=pl.BlockSpec((1, tile_b), lambda i: (0, i)),
        compiler_params=compiler_params,
        cost_estimate=cost,
    )(x, w1, b1, w2, b2, w3, b3)

    # (1, batch_p) -> (batch, 1)
    return out[0, :batch].reshape(batch, 1)


def init_params(key, input_size):
    """PyTorch-style default init: U(-1/sqrt(fan_in), 1/sqrt(fan_in)).

    Weights stored as (out_features, in_features) (PyTorch layout) except w3,
    which is stored transposed as (16, 1) for the in-kernel VPU reduction.
    Biases stored as (out_features, 1) columns for lane-broadcast adds.
    """
    h1_dim, h2_dim, out_dim = 64, 16, 1
    dims = [(input_size, h1_dim), (h1_dim, h2_dim), (h2_dim, out_dim)]
    params = []
    for (fan_in, fan_out) in dims:
        key, kw, kb = jax.random.split(key, 3)
        bound = 1.0 / np.sqrt(fan_in)
        w = jax.random.uniform(kw, (fan_out, fan_in), jnp.float32, -bound, bound)
        b = jax.random.uniform(kb, (fan_out, 1), jnp.float32, -bound, bound)
        params.extend([w, b])
    w1, b1, w2, b2, w3, b3 = params
    return [w1, b1, w2, b2, w3.T, b3]   # w3 -> (16, 1)


def reference_forward(x, params):
    w1, b1, w2, b2, w3, b3 = params
    h1 = jnp.maximum(x @ w1.T + b1.T, 0.0)
    h2 = jnp.maximum(h1 @ w2.T + b2.T, 0.0)
    return jnp.tanh(h2 @ w3 + b3)        # w3: (16, 1), b3: (1, 1)


if __name__ == "__main__":
    input_size = 32
    batch = 8
    key = jax.random.PRNGKey(0)
    key, kx = jax.random.split(key)
    x = jax.random.normal(kx, (batch, input_size), jnp.float32)
    params = init_params(key, input_size)

    ref = reference_forward(x, params)

    # f32 path: tight tolerance.
    out_f32 = classifier_forward(x, params, use_bf16=False)
    jax.block_until_ready(out_f32)
    np.testing.assert_allclose(np.asarray(out_f32), np.asarray(ref),
                               rtol=1e-5, atol=1e-5)
    assert out_f32.shape == (batch, 1)

    # Default bf16 layer-1 path: looser tolerance from bf16 quantization.
    out_bf16 = classifier_forward(x, params, use_bf16=True)
    jax.block_until_ready(out_bf16)
    np.testing.assert_allclose(np.asarray(out_bf16), np.asarray(ref),
                               rtol=1e-1, atol=1e-1)
    assert out_bf16.shape == (batch, 1)

    print("KERNEL_OK")
</pallas_src>

<mosaic_0001>
module attributes {stable_mosaic.version = 11 : i64} {
  func.func @mlp_kernel(%arg0: i32, %arg1: memref<128x32xf32, #tpu.memory_space<vmem>>, %arg2: memref<64x32xf32, #tpu.memory_space<vmem>>, %arg3: memref<64x1xf32, #tpu.memory_space<vmem>>, %arg4: memref<16x64xf32, #tpu.memory_space<vmem>>, %arg5: memref<16x1xf32, #tpu.memory_space<vmem>>, %arg6: memref<16x1xf32, #tpu.memory_space<vmem>>, %arg7: memref<1x1xf32, #tpu.memory_space<vmem>>, %arg8: memref<1x128xf32, #tpu.memory_space<vmem>>) attributes {dimension_semantics = [#tpu.dimension_semantics<parallel>], iteration_bounds = array<i64: 1>, scalar_prefetch = 0 : i64, scratch_operands = 0 : i64, tpu.core_type = #tpu.core_type<tc>, window_params = [{transform_indices = @transform_0, window_bounds = array<i64: 128, 32>}, {pipeline_mode = #tpu.pipeline_mode<synchronous>, transform_indices = @transform_1, window_bounds = array<i64: 64, 32>}, {pipeline_mode = #tpu.pipeline_mode<synchronous>, transform_indices = @transform_2, window_bounds = array<i64: 64, 1>}, {pipeline_mode = #tpu.pipeline_mode<synchronous>, transform_indices = @transform_3, window_bounds = array<i64: 16, 64>}, {pipeline_mode = #tpu.pipeline_mode<synchronous>, transform_indices = @transform_4, window_bounds = array<i64: 16, 1>}, {pipeline_mode = #tpu.pipeline_mode<synchronous>, transform_indices = @transform_5, window_bounds = array<i64: 16, 1>}, {pipeline_mode = #tpu.pipeline_mode<synchronous>, transform_indices = @transform_6, window_bounds = array<i64: 1, 1>}, {transform_indices = @transform_7, window_bounds = array<i64: 1, 128>}]} {
    %c0 = arith.constant 0 : index
    %c0_0 = arith.constant 0 : index
    %0 = vector.load %arg1[%c0, %c0_0] : memref<128x32xf32, #tpu.memory_space<vmem>>, vector<128x32xf32>
    %c0_1 = arith.constant 0 : index
    %c0_2 = arith.constant 0 : index
    %1 = vector.load %arg2[%c0_1, %c0_2] : memref<64x32xf32, #tpu.memory_space<vmem>>, vector<64x32xf32>
    %cst = arith.constant dense<0.000000e+00> : vector<64x128xf32>
    %2 = tpu.matmul %1, %0, %cst {dimension_numbers = #tpu.dot_dimension_numbers<[1], [1], [0], [0], [0, 0, 1, 0], [], []>} : vector<64x32xf32>, vector<128x32xf32>, vector<64x128xf32> -> vector<64x128xf32>
    %c0_3 = arith.constant 0 : index
    %c0_4 = arith.constant 0 : index
    %3 = vector.load %arg3[%c0_3, %c0_4] : memref<64x1xf32, #tpu.memory_space<vmem>>, vector<64x1xf32>
    %4 = vector.broadcast %3 : vector<64x1xf32> to vector<64x128xf32>
    %5 = arith.addf %2, %4 : vector<64x128xf32>
    %cst_5 = arith.constant 0.000000e+00 : f32
    %6 = vector.broadcast %cst_5 : f32 to vector<64x128xf32>
    %7 = arith.maximumf %5, %6 : vector<64x128xf32>
    %c0_6 = arith.constant 0 : index
    %c0_7 = arith.constant 0 : index
    %8 = vector.load %arg4[%c0_6, %c0_7] : memref<16x64xf32, #tpu.memory_space<vmem>>, vector<16x64xf32>
    %cst_8 = arith.constant dense<0.000000e+00> : vector<16x128xf32>
    %9 = tpu.matmul %8, %7, %cst_8 {dimension_numbers = #tpu.dot_dimension_numbers<[1], [0], [0], [1], [0, 0, 1, 1], [], []>} : vector<16x64xf32>, vector<64x128xf32>, vector<16x128xf32> -> vector<16x128xf32>
    %c0_9 = arith.constant 0 : index
    %c0_10 = arith.constant 0 : index
    %10 = vector.load %arg5[%c0_9, %c0_10] : memref<16x1xf32, #tpu.memory_space<vmem>>, vector<16x1xf32>
    %11 = vector.broadcast %10 : vector<16x1xf32> to vector<16x128xf32>
    %12 = arith.addf %9, %11 : vector<16x128xf32>
    %cst_11 = arith.constant 0.000000e+00 : f32
    %13 = vector.broadcast %cst_11 : f32 to vector<16x128xf32>
    %14 = arith.maximumf %12, %13 : vector<16x128xf32>
    %c0_12 = arith.constant 0 : index
    %c0_13 = arith.constant 0 : index
    %15 = vector.load %arg6[%c0_12, %c0_13] : memref<16x1xf32, #tpu.memory_space<vmem>>, vector<16x1xf32>
    %16 = vector.broadcast %15 : vector<16x1xf32> to vector<16x128xf32>
    %17 = arith.mulf %16, %14 : vector<16x128xf32>
    %cst_14 = arith.constant dense<0.000000e+00> : vector<128xf32>
    %18 = vector.multi_reduction <add>, %17, %cst_14 [0] : vector<16x128xf32> to vector<128xf32>
    %19 = vector.shape_cast %18 : vector<128xf32> to vector<1x128xf32>
    %c0_15 = arith.constant 0 : index
    %c0_16 = arith.constant 0 : index
    %20 = vector.load %arg7[%c0_15, %c0_16] : memref<1x1xf32, #tpu.memory_space<vmem>>, vector<1x1xf32>
    %21 = vector.broadcast %20 : vector<1x1xf32> to vector<1x128xf32>
    %22 = arith.addf %19, %21 : vector<1x128xf32>
    %23 = math.tanh %22 : vector<1x128xf32>
    %c0_17 = arith.constant 0 : index
    %c0_18 = arith.constant 0 : index
    %24 = vector.load %arg8[%c0_17, %c0_18] : memref<1x128xf32, #tpu.memory_space<vmem>>, vector<1x128xf32>
    tpu.vector_store %arg8[%c0_17, %c0_18], %23 {strides = array<i32>} : memref<1x128xf32, #tpu.memory_space<vmem>>, vector<1x128xf32>,
    return
  }
  func.func @transform_0(%arg0: i32) -> (i32, i32) {
    %c0_i32 = arith.constant 0 : i32
    %c0_i32_0 = arith.constant 0 : i32
    return %arg0, %c0_i32 : i32, i32
  }
  func.func @transform_1(%arg0: i32) -> (i32, i32) {
    %c0_i32 = arith.constant 0 : i32
    %c0_i32_0 = arith.constant 0 : i32
    %c0_i32_1 = arith.constant 0 : i32
    return %c0_i32, %c0_i32_0 : i32, i32
  }
  func.func @transform_2(%arg0: i32) -> (i32, i32) {
    %c0_i32 = arith.constant 0 : i32
    %c0_i32_0 = arith.constant 0 : i32
    %c0_i32_1 = arith.constant 0 : i32
    return %c0_i32, %c0_i32_0 : i32, i32
  }
  func.func @transform_3(%arg0: i32) -> (i32, i32) {
    %c0_i32 = arith.constant 0 : i32
    %c0_i32_0 = arith.constant 0 : i32
    %c0_i32_1 = arith.constant 0 : i32
    return %c0_i32, %c0_i32_0 : i32, i32
  }
  func.func @transform_4(%arg0: i32) -> (i32, i32) {
    %c0_i32 = arith.constant 0 : i32
    %c0_i32_0 = arith.constant 0 : i32
    %c0_i32_1 = arith.constant 0 : i32
    return %c0_i32, %c0_i32_0 : i32, i32
  }
  func.func @transform_5(%arg0: i32) -> (i32, i32) {
    %c0_i32 = arith.constant 0 : i32
    %c0_i32_0 = arith.constant 0 : i32
    %c0_i32_1 = arith.constant 0 : i32
    return %c0_i32, %c0_i32_0 : i32, i32
  }
  func.func @transform_6(%arg0: i32) -> (i32, i32) {
    %c0_i32 = arith.constant 0 : i32
    %c0_i32_0 = arith.constant 0 : i32
    %c0_i32_1 = arith.constant 0 : i32
    return %c0_i32, %c0_i32_0 : i32, i32
  }
  func.func @transform_7(%arg0: i32) -> (i32, i32) {
    %c0_i32 = arith.constant 0 : i32
    %c0_i32_0 = arith.constant 0 : i32
    return %c0_i32, %arg0 : i32, i32
  }
}

</mosaic_0001>

<bundles_post_ra>
// kernel: tpu_custom_call.1
= control target key start
LH: loop header
LB: loop body
LE: loop exit
PB: predicated region body
PF: predicated region fallthrough
CT: control target
= control target key end

     0   :  { %s869_s0 = inlined_call_operand.vmem [shape: f32[128,32], index: 0, kind: input, shape index: {}]   ;;  %s870_s1 = inlined_call_operand.vmem [shape: f32[64,32], index: 1, kind: input, shape index: {}]   ;;  %s871_s2 = inlined_call_operand.vmem [shape: f32[64,1], index: 2, kind: input, shape index: {}]   ;;  %s872_s3 = inlined_call_operand.vmem [shape: f32[16,64], index: 3, kind: input, shape index: {}]   ;;  %s873_s4 = inlined_call_operand.vmem [shape: f32[16,1], index: 4, kind: input, shape index: {}]   ;;  %s874_s5 = inlined_call_operand.vmem [shape: f32[16,1], index: 5, kind: input, shape index: {}]   ;;  %s875_s6 = inlined_call_operand.<no memory space> [shape: f32[1,1], index: 6, kind: input, shape index: {}]   ;;  %s876_s7 = inlined_call_operand.hbm [shape: f32[1,128], index: 7, kind: output, shape index: {}]  }
   0x1   :  { %v12_v0 = vstv %s875_s6 }
   0x2   :  { %13 = vst [vmem:[#allocation2] sm:$0x1] %v12_v0 }
   0x3   :  { %v29_v1 = vld [vmem:[%s869_s0] sm:$0xff]  ;;  %v30_v2 = vld [vmem:[%s869_s0 + $0x8] sm:$0xff]  ;;  %vm101_vm0 = vcmask 261120   ;;  %v31_v3 = vld [vmem:[%s869_s0 + $0x10] sm:$0xff]  ;;  %v650_v7 = vmov 0  }
   0x4   :  { %v556_v4 = vpack.c.bf16 %v30_v2, %v29_v1  ;;  %vm706_vm1 = vmpackc.low %vm101_vm0, %vm101_vm0  ;;  %v32_v6 = vld [vmem:[%s869_s0 + $0x18] sm:$0xff]  ;;  %622 = vset.pattern.permute.xlu0 %v650_v7  ;;  %623 = vset.pattern.permute.xlu1 %v650_v7  ;;  %v45_v9 = vld [vmem:[%s870_s1] sm:$0xff] }
   0x5   :  { %v562_v8 = vpack.c.bf16 %v32_v6, %v31_v3  ;;  %v33_v10 = vld [vmem:[%s869_s0 + $0x20] sm:$0xff]  ;;  %v34_v11 = vld [vmem:[%s869_s0 + $0x28] sm:$0xff]  ;;  %525 = vmatprep.mubr.msk.f32.mxu0 %vm101_vm0, %v45_v9  ;;  %v55_v14 = vld [vmem:[%s871_s2 + $0x10] sm:$0xff] }
   0x6   :  { %558 = vmatprep.subr.msk.bf16.mxu0 %vm706_vm1, %v556_v4  ;;  %v53_v12 = vld [vmem:[%s871_s2] sm:$0xff]  ;;  %v568_v13 = vpack.c.bf16 %v34_v11, %v33_v10  ;;  %v54_v15 = vld [vmem:[%s871_s2 + $0x8] sm:$0xff]  ;;  %73 = vperm.xlu1 %623, %v55_v14   ;;  %v56_v16 = vld [vmem:[%s871_s2 + $0x18] sm:$0xff] }
   0x7   :  { %561 = vmatpush3.bf16.xpose.msk.msra.mxu0 %vm706_vm1, %v556_v4  ;;  %63 = vperm.xlu0 %622, %v53_v12  }
   0x8   :  { %564 = vmatprep.subr.msk.bf16.mxu0 %vm706_vm1, %v562_v8 }
   0xf   :  { %567 = vmatpush3.bf16.xpose.msk.msra.mxu0 %vm706_vm1, %v562_v8 }
  0x10   :  { %14 = vsyncpa [#allocation4], 0  ;;  %570 = vmatprep.subr.msk.bf16.mxu0 %vm706_vm1, %v568_v13  ;;  %68 = vperm.xlu0 %622, %v54_v15   ;;  %v35_v17 = vld [vmem:[%s869_s0 + $0x30] sm:$0xff]  ;;  %v36_v18 = vld [vmem:[%s869_s0 + $0x38] sm:$0xff]  ;;  %vm301_vm2 = vcmask 523264  }
  0x11   :  { %v57_v19 = vld [vmem:[%s871_s2 + $0x20] sm:$0xff]  ;;  %78 = vperm.xlu1 %623, %v56_v16   ;;  %v58_v20 = vld [vmem:[%s871_s2 + $0x28] sm:$0xff]  ;;  %v574_v21 = vpack.c.bf16 %v36_v18, %v35_v17  ;;  %v59_v22 = vld [vmem:[%s871_s2 + $0x30] sm:$0xff] }
  0x12   :  { %v60_v23 = vld [vmem:[%s871_s2 + $0x38] sm:$0xff]  ;;  %v37_v24 = vld [vmem:[%s869_s0 + $0x40] sm:$0xff]  ;;  %v38_v25 = vld [vmem:[%s869_s0 + $0x48] sm:$0xff] }
  0x13   :  { %v289_v26 = vld [vmem:[%s873_s4] sm:$0xff]  ;;  %v290_v27 = vld [vmem:[%s873_s4 + $0x8] sm:$0xff]  ;;  %v580_v28 = vpack.c.bf16 %v38_v25, %v37_v24  ;;  %v39_v31 = vld [vmem:[%s869_s0 + $0x50] sm:$0xff] }
  0x14   :  { %83 = vperm.xlu0 %622, %v57_v19   ;;  %v385_v29 = vld [vmem:[%s874_s5] sm:$0xff]  ;;  %v386_v30 = vld [vmem:[%s874_s5 + $0x8] sm:$0xff]  ;;  %v40_v32 = vld [vmem:[%s869_s0 + $0x58] sm:$0xff] }
  0x15   :  { %88 = vperm.xlu1 %623, %v58_v20   ;;  %v406_v33 = vld [vmem:[#allocation2] sm:$0x1]  ;;  %v586_v34 = vpack.c.bf16 %v40_v32, %v39_v31  ;;  %v42_v36 = vld [vmem:[%s869_s0 + $0x68] sm:$0xff]  ;;  %v43_v38 = vld [vmem:[%s869_s0 + $0x70] sm:$0xff] }
  0x16   :  { %v41_v35 = vld [vmem:[%s869_s0 + $0x60] sm:$0xff]  ;;  %v44_v39 = vld [vmem:[%s869_s0 + $0x78] sm:$0xff]  ;;  %v46_v41 = vld [vmem:[%s870_s1 + $0x8] sm:$0xff] }
  0x17   :  { %573 = vmatpush3.bf16.xpose.msk.msra.mxu0 %vm706_vm1, %v568_v13  ;;  %v592_v37 = vpack.c.bf16 %v42_v36, %v41_v35  ;;  %v598_v40 = vpack.c.bf16 %v44_v39, %v43_v38  ;;  %v47_v42 = vld [vmem:[%s870_s1 + $0x10] sm:$0xff]  ;;  %v48_v43 = vld [vmem:[%s870_s1 + $0x18] sm:$0xff]  ;;  %v49_v44 = vld [vmem:[%s870_s1 + $0x20] sm:$0xff] }
  0x18   :  { %576 = vmatprep.subr.msk.bf16.mxu0 %vm706_vm1, %v574_v21  ;;  %93 = vperm.xlu0 %622, %v59_v22   ;;  %v50_v45 = vld [vmem:[%s870_s1 + $0x28] sm:$0xff]  ;;  %v51_v46 = vld [vmem:[%s870_s1 + $0x30] sm:$0xff]  ;;  %v52_v47 = vld [vmem:[%s870_s1 + $0x38] sm:$0xff] }
  0x19   :  { %98 = vperm.xlu1 %623, %v60_v23   ;;  %v287_v48 = vld [vmem:[%s872_s3] sm:$0xff] }
  0x1a   :  { %553 = vmatprep.mubr.msk.f32.mxu1 %vm301_vm2, %v287_v48 }
  0x1c   :  { %293 = vperm.xlu0 %622, %v289_v26  }
  0x1d   :  { %298 = vperm.xlu1 %623, %v290_v27  }
  0x1f   :  { %579 = vmatpush3.bf16.xpose.msk.msra.mxu0 %vm706_vm1, %v574_v21  ;;  %v288_v21 = vld [vmem:[%s872_s3 + $0x8] sm:$0xff]  ;;  %s651_s3 = smov [#allocation3]  }
  0x20   :  { %582 = vmatprep.subr.msk.bf16.mxu0 %vm706_vm1, %v580_v28  ;;  %389 = vperm.xlu0 %622, %v385_v29   ;;  %s425_s4 = sshll.u32 %s651_s3, 4  ;;  %s426_s4 = int_to_ptr.vmem [resolvable:$true] %s425_s4 }
  0x21   :  { %394 = vperm.xlu1 %623, %v386_v30   ;;  %s626_s24 = scalar_lea.vmem %s426_s4, 16  ;;  %s630_s25 = scalar_lea.vmem %s426_s4, 32 }
  0x22   :  { %p627_p0 = scmp.ne.s32.totalorder %s426_s4, %s626_s24  ;;  %p631_p1 = scmp.lt.s32.totalorder %s426_s4, %s426_s4 }
  0x23   :  { %p632_p2 = scmp.lt.s32.totalorder %s630_s25, %s626_s24 }
  0x24   :  { %409 = vperm.xlu0 %622, %v406_v33  }
  0x25   :  { %p633_p3 = por %p632_p2, %p631_p1 }
  0x27   :  { %585 = vmatpush3.bf16.xpose.msk.msra.mxu0 %vm706_vm1, %v580_v28  ;;  %p634_p4 = pnand %p633_p3, %p627_p0 }
  0x28   :  { %588 = vmatprep.subr.msk.bf16.mxu0 %vm706_vm1, %v586_v34 }
  0x2f   :  { %591 = vmatpush3.bf16.xpose.msk.msra.mxu0 %vm706_vm1, %v586_v34  ;;  %v412_v34 = vlaneseq }
  0x30   :  { %594 = vmatprep.subr.msk.bf16.mxu0 %vm706_vm1, %v592_v37 }
  0x37   :  { %597 = vmatpush3.bf16.xpose.msk.msra.mxu0 %vm706_vm1, %v592_v37  ;;  %v413_v37 = vshrl.u32 %v412_v34, 7 }
  0x38   :  { %600 = vmatprep.subr.msk.bf16.mxu0 %vm706_vm1, %v598_v40 }
  0x3f   :  { %603 = vmatpush3.bf16.xpose.msk.msra.mxu0 %vm706_vm1, %v598_v40  ;;  %v414_v40 = vsub.s32 0, %v413_v37 }
  0x46   :  { %526 = vmatmul.mubr.msk.f32.vlgmr.msra.gmra.mrb[0].mxu0 %vm101_vm0, %v46_v41 }
  0x47   :  { %528 = vmatprep.mubr.msk.f32.mxu0 %vm101_vm0, %v47_v42 }
  0x4a   :  { %529 = vmatmul.mubr.msk.f32.gmra.mrb[2].mxu0 %vm101_vm0, %v48_v43 }
  0x4b   :  { %531 = vmatprep.mubr.msk.f32.mxu0 %vm101_vm0, %v49_v44 }
  0x4e   :  { %532 = vmatmul.mubr.msk.f32.gmra.mrb[4].mxu0 %vm101_vm0, %v50_v45 }
  0x4f   :  { %534 = vmatprep.mubr.msk.f32.mxu0 %vm101_vm0, %v51_v46 }
  0x52   :  { %535 = vmatmul.mubr.msk.f32.gmra.mrb[6].mxu0 %vm101_vm0, %v52_v47 }
  0x85   :  { %v74_v50 = vpop.permute.xlu1 %73 }
  0x86   :  { %v64_v49 = vpop.permute.xlu0 %63 }
  0x8f   :  { %v69_v51 = vpop.permute.xlu0 %68 }
  0x90   :  { %v79_v52 = vpop.permute.xlu1 %78 }
  0x93   :  { %v84_v1 = vpop.permute.xlu0 %83 }
  0x94   :  { %v89_v62 = vpop.permute.xlu1 %88 }
  0x97   :  { %v94_v13 = vpop.permute.xlu0 %93 }
  0x98   :  { %v99_v10 = vpop.permute.xlu1 %98 }
  0x9b   :  { %v294_v23 = vpop.permute.xlu0 %293 }
  0x9c   :  { %v299_v22 = vpop.permute.xlu1 %298 }
  0x9f   :  { %v390_v31 = vpop.permute.xlu0 %389 }
  0xa0   :  { %v395_v29 = vpop.permute.xlu1 %394 }
  0xa3   :  { %v410_v42 = vpop.permute.xlu0 %409 }
  0xa4   :  { %v415_v44 = vrot.slane %v410_v42, %v414_v40 }
 0x119   :  { %v527_v53 = vpop.f32.mrb[0].mxu0 }
 0x11a   :  { %v246_v54 = vadd.f32 %v527_v53, %v69_v51  ;;  %v240_v55 = vpop.f32.mrb[1].mxu0 }
 0x11b   :  { %v241_v56 = vadd.f32 %v240_v55, %v64_v49 }
 0x11c   :  { %v280_v57 = vmax.f32 %v246_v54, 0.0 }
 0x11d   :  { %v279_v58 = vmax.f32 %v241_v56, 0.0  ;;  %v530_v59 = vpop.f32.mrb[2].mxu0 }
 0x11e   :  { %v256_v60 = vadd.f32 %v530_v59, %v79_v52  ;;  %v250_v61 = vpop.f32.mrb[3].mxu0 }
 0x11f   :  { %v251_v63 = vadd.f32 %v250_v61, %v74_v50  ;;  %v604_v0 = vpack.c.bf16 %v280_v57, %v279_v58 }
 0x120   :  { %v282_v2 = vmax.f32 %v256_v60, 0.0 }
 0x121   :  { %v281_v3 = vmax.f32 %v251_v63, 0.0  ;;  %v533_v4 = vpop.f32.mrb[4].mxu0  ;;  %605 = vmatprep.subr.bf16.mxu1 %v604_v0 }
 0x122   :  { %v266_v5 = vadd.f32 %v533_v4, %v89_v62  ;;  %v260_v6 = vpop.f32.mrb[5].mxu0  ;;  %607 = vmatpush3.bf16.msra.mxu1 %v604_v0 }
 0x123   :  { %v608_v7 = vpack.c.bf16 %v282_v2, %v281_v3  ;;  %v261_v8 = vadd.f32 %v260_v6, %v84_v1 }
 0x124   :  { %v284_v9 = vmax.f32 %v266_v5, 0.0 }
 0x125   :  { %v283_v11 = vmax.f32 %v261_v8, 0.0  ;;  %v536_v12 = vpop.f32.mrb[6].mxu0  ;;  %609 = vmatprep.subr.bf16.mxu1 %v608_v7 }
 0x126   :  { %v276_v14 = vadd.f32 %v536_v12, %v99_v10  ;;  %v270_v15 = vpop.f32.mrb[7].mxu0  ;;  %611 = vmatpush3.bf16.msra.mxu1 %v608_v7 }
 0x127   :  { %v612_v16 = vpack.c.bf16 %v284_v9, %v283_v11  ;;  %v271_v17 = vadd.f32 %v270_v15, %v94_v13 }
 0x128   :  { %v286_v18 = vmax.f32 %v276_v14, 0.0 }
 0x129   :  { %v285_v19 = vmax.f32 %v271_v17, 0.0  ;;  %613 = vmatprep.subr.bf16.mxu1 %v612_v16 }
 0x12a   :  { %615 = vmatpush3.bf16.msra.mxu1 %v612_v16 }
 0x12b   :  { %v616_v20 = vpack.c.bf16 %v286_v18, %v285_v19 }
 0x12d   :  { %617 = vmatprep.subr.bf16.mxu1 %v616_v20 }
 0x12e   :  { %619 = vmatpush3.bf16.msra.mxu1 %v616_v20 }
 0x131   :  { %554 = vmatmul.mubr.msk.f32.vlgmr.msra.gmra.mrb[0].mxu1 %vm301_vm2, %v288_v21 }
 0x204   :  { %v555_v24 = vpop.f32.mrb[0].mxu1 }
 0x205   :  { %v380_v25 = vadd.f32 %v555_v24, %v299_v22  ;;  %v374_v26 = vpop.f32.mrb[1].mxu1 }
 0x206   :  { %v375_v27 = vadd.f32 %v374_v26, %v294_v23 }
 0x207   :  { %v384_v28 = vmax.f32 %v380_v25, 0.0 }
 0x208   :  { %v383_v30 = vmax.f32 %v375_v27, 0.0 }
 0x209   :  { %v398_v32 = vmul.f32 %v395_v29, %v384_v28 }
 0x20a   :  { %v397_v33 = vmul.f32 %v390_v31, %v383_v30 }
 0x20c   :  { %v399_v35 = vadd.f32 %v398_v32, %v397_v33 }
 0x20e   :  { %v400_v36 = vrot.slane %v399_v35, 4 }
 0x210   :  { %v401_v38 = vadd.f32 %v400_v36, %v399_v35 }
 0x212   :  { %v402_v39 = vrot.slane %v401_v38, 2 }
 0x214   :  { %v403_v41 = vadd.f32 %v402_v39, %v401_v38 }
 0x216   :  { %v404_v43 = vrot.slane %v403_v41, 1 }
 0x218   :  { %v405_v45 = vadd.f32 %v404_v43, %v403_v41 }
 0x21a   :  { %v416_v46 = vadd.f32 %v415_v44, %v405_v45 }
 0x21c   :  { %624 = vtanh.f32 %v416_v46 }
 0x226   :  { %v625_v47 = vpop.eup %624 }
 0x227   :  { %418 = vst [vmem:[#allocation3] sm:$0x1] %v625_v47 }
 0x228   :  { %637 = shalt.err (!%p634_p4)
}
 0x229   :  { %s638_s27 = scalar_lea.hbm %s876_s7, 16 }
 0x22a   :  { %p639_p5 = scmp.ne.s32.totalorder %s876_s7, %s638_s27  ;;  %p642_p6 = scmp.lt.u32.totalorder %s638_s27, %s876_s7 }
 0x22c   :  { %p644_p7 = pnand %p642_p6, %p639_p5 }
 0x22e   :  { %647 = shalt.err (!%p644_p7)
}
 0x22f   :  { %428 = dma.vmem_to_hbm [thread:$0]  %s426_s4, 16, %s876_s7, [#allocation4]  }
 0x230   :  { %648 = dma.done.wait [#allocation4], 16  }
 0x231   :  { %649 = vsyncadd [#allocation4], 4294967280 }
 0x232   :  { %432 = vsyncpa [#allocation4], 1 }

</bundles_post_ra>
